<compile_context>
chip_gen: v7x
topology: tpu7x:2x2x1
jax: 0.10.0
libtpu: 0.0.40
codegen_flags: <defaults>
</compile_context>

<pallas_src>
import functools

import jax
import jax.numpy as jnp
from jax.experimental import pallas as pl
from jax.experimental.pallas import tpu as pltpu


# Tables up to this many bytes take the VMEM-resident fast path.  Conservative
# so (double-buffered) table + output blocks stay well under v5e's 16 MiB
# default scoped-VMEM limit (v6e/v7x default to 32 MiB).
_VMEM_TABLE_BYTES = 4 * 1024 * 1024

# DMA semaphores shared round-robin by the row-gather DMAs on the HBM path.
# All copies have identical size, so waiting on the kept descriptors in order
# is correct even when one semaphore is shared by several in-flight copies.
_NUM_GATHER_SEMS = 8


def _gather_hbm_kernel(rows_per_block, ids_ref, table_hbm, out_ref, sems):
    """Large-table path: per-row HBM->VMEM DMAs landing directly in out_ref.

    ids_ref:   (N_pad,)             int32 in SMEM (scalar prefetch)
    table_hbm: (V, D)               embedding table left in HBM
    out_ref:   (rows_per_block, D)  pipelined VMEM output block (DMA target)
    sems:      (_NUM_GATHER_SEMS,)  DMA semaphores (shared round-robin)
    """
    base = pl.program_id(0) * rows_per_block

    # Hoist every SMEM id read before any .wait() so the scalar path stays off
    # the critical path (waits break SMEM store->load forwarding).
    row_ids = [ids_ref[base + r] for r in range(rows_per_block)]

    # Issue all row gathers; they are in flight concurrently.  Keep the
    # descriptors so the waits reuse them exactly.
    copies = []
    for r in range(rows_per_block):
        cp = pltpu.make_async_copy(
            table_hbm.at[pl.ds(row_ids[r], 1), :],
            out_ref.at[pl.ds(r, 1), :],
            sems.at[r % _NUM_GATHER_SEMS],
        )
        cp.start()
        copies.append(cp)

    # All waits complete before the body ends, so the pipelined writeback of
    # out_ref sees fully gathered data.
    for cp in copies:
        cp.wait()
    # TODO(synk): cross-step prefetch of the *next* block's gathers is not
    # expressible while DMAing straight into the pipelined output block; the
    # many concurrent per-step DMAs plus the pipelined output writeback already
    # hide most of the HBM latency.


def _gather_vmem_kernel(rows_per_block, ids_ref, table_ref, out_ref):
    """Small-table fast path: table resident in VMEM, dynamic-slice row loads."""
    base = pl.program_id(0) * rows_per_block
    for r in range(rows_per_block):
        row_id = ids_ref[base + r]
        out_ref[pl.ds(r, 1), :] = table_ref[pl.ds(row_id, 1), :]


@functools.partial(jax.jit, static_argnames=("rows_per_block", "use_vmem_table"))
def keys_forward(inputs, table, *, rows_per_block=128, use_vmem_table=None):
    """Pallas equivalent of Keys.forward.

    inputs: integer token ids, shape (B, S)
    table:  embedding table, shape (vocab_size, dim_key)
    returns: (B, S, dim_key) array with dtype of `table`
    """
    b, s = inputs.shape
    v, d = table.shape
    n = b * s
    itemsize = table.dtype.itemsize

    ids = inputs.reshape(n).astype(jnp.int32)
    # TODO(synk): torch.nn.Embedding raises on out-of-range ids; there is no
    # clean Pallas equivalent, so clamp instead (valid inputs are unaffected).
    ids = jnp.clip(ids, 0, v - 1)

    # Block size: big enough to amortize ~0.35us/step grid overhead and keep
    # many row DMAs in flight, but don't over-pad tiny inputs.  Must stay a
    # multiple of 8 so the (rows, D) output block is sublane-aligned.
    rpb = min(int(rows_per_block), max(8, pl.next_power_of_2(n)))
    rpb = max(8, (rpb // 8) * 8)

    n_pad = pl.cdiv(n, rpb) * rpb
    if n_pad != n:
        # Padded tail rows gather row 0 and are dropped below.
        ids = jnp.pad(ids, (0, n_pad - n))

    if use_vmem_table is None:
        use_vmem_table = (v * d * itemsize) <= _VMEM_TABLE_BYTES

    out_spec = pl.BlockSpec((rpb, d), lambda i, ids_ref: (i, 0))

    if use_vmem_table:
        kernel = functools.partial(_gather_vmem_kernel, rpb)
        # Constant index_map: the whole table is DMA'd into VMEM once and stays
        # resident across grid steps.
        in_specs = [pl.BlockSpec((v, d), lambda i, ids_ref: (0, 0))]
        scratch_shapes = []
        bytes_accessed = (v * d + 2 * n_pad * d) * itemsize
    else:
        kernel = functools.partial(_gather_hbm_kernel, rpb)
        in_specs = [pl.BlockSpec(memory_space=pl.ANY)]   # table stays in HBM
        scratch_shapes = [pltpu.SemaphoreType.DMA((_NUM_GATHER_SEMS,))]
        bytes_accessed = 2 * n_pad * d * itemsize

    out_flat = pl.pallas_call(
        kernel,
        out_shape=jax.ShapeDtypeStruct((n_pad, d), table.dtype),
        grid_spec=pltpu.PrefetchScalarGridSpec(
            num_scalar_prefetch=1,            # ids -> SMEM
            grid=(n_pad // rpb,),
            in_specs=in_specs,
            out_specs=out_spec,
            scratch_shapes=scratch_shapes,
        ),
        compiler_params=pltpu.CompilerParams(
            dimension_semantics=("parallel",),  # shard token blocks across TCs
        ),
        cost_estimate=pl.CostEstimate(
            flops=0, transcendentals=0, bytes_accessed=int(bytes_accessed)),
    )(ids, table)

    return out_flat[:n].reshape(b, s, d)


def init_keys_params(vocab_size, dim_key):
    # torch: self.keys.weight.data.uniform_(0, 0)  -> all zeros, deterministic.
    return jnp.zeros((vocab_size, dim_key), dtype=jnp.float32)


if __name__ == "__main__":
    # Lane-dense dim_key (128); table = 512 KiB so the auto path is VMEM-resident.
    vocab_size, dim_key = 1024, 128
    batch, seq = 2, 8

    key = jax.random.PRNGKey(0)
    k_ids, k_tab = jax.random.split(key)
    inputs = jax.random.randint(k_ids, (batch, seq), 0, vocab_size, dtype=jnp.int32)

    # 1) Gather correctness vs a non-zero random table -- VMEM fast path (auto).
    rand_table = jax.random.normal(k_tab, (vocab_size, dim_key), dtype=jnp.float32)
    ref_rand = rand_table[inputs]
    out_vmem = jax.block_until_ready(keys_forward(inputs, rand_table))
    assert out_vmem.shape == (batch, seq, dim_key)
    assert out_vmem.dtype == jnp.float32
    assert jnp.allclose(out_vmem, ref_rand)

    # 2) Same check forcing the large-table HBM DMA-gather path.
    out_hbm = jax.block_until_ready(
        keys_forward(inputs, rand_table, use_vmem_table=False))
    assert jnp.allclose(out_hbm, ref_rand)

    # 3) Module-faithful check: zero-initialized weights -> all-zero output,
    #    exactly matching the PyTorch `Keys` module.
    table = init_keys_params(vocab_size, dim_key)
    out = jax.block_until_ready(keys_forward(inputs, table))
    assert out.shape == (batch, seq, dim_key)
    assert jnp.allclose(out, table[inputs])

    print("KERNEL_OK")
</pallas_src>

<mosaic_0001>
module attributes {stable_mosaic.version = 11 : i64} {
  func.func @_gather_vmem_kernel(%arg0: i32, %arg1: memref<16xi32, #tpu.memory_space<smem>>, %arg2: memref<1024x128xf32, #tpu.memory_space<vmem>>, %arg3: memref<16x128xf32, #tpu.memory_space<vmem>>) attributes {dimension_semantics = [#tpu.dimension_semantics<parallel>], iteration_bounds = array<i64: 1>, scalar_prefetch = 1 : i64, scratch_operands = 0 : i64, tpu.core_type = #tpu.core_type<tc>, window_params = [{pipeline_mode = #tpu.pipeline_mode<synchronous>, transform_indices = @transform_0, window_bounds = array<i64: 1024, 128>}, {transform_indices = @transform_1, window_bounds = array<i64: 16, 128>}]} {
    %c16_i32 = arith.constant 16 : i32
    %0 = arith.muli %arg0, %c16_i32 : i32
    %c0_i32 = arith.constant 0 : i32
    %1 = arith.addi %0, %c0_i32 : i32
    %2 = arith.index_cast %1 : i32 to index
    %3 = memref.load %arg1[%2] : memref<16xi32, #tpu.memory_space<smem>>
    %4 = arith.index_cast %3 : i32 to index
    %c0 = arith.constant 0 : index
    %5 = vector.load %arg2[%4, %c0] : memref<1024x128xf32, #tpu.memory_space<vmem>>, vector<1x128xf32>
    %c0_0 = arith.constant 0 : index
    %c0_1 = arith.constant 0 : index
    %6 = vector.load %arg3[%c0_0, %c0_1] : memref<16x128xf32, #tpu.memory_space<vmem>>, vector<1x128xf32>
    tpu.vector_store %arg3[%c0_0, %c0_1], %5 {strides = array<i32>} : memref<16x128xf32, #tpu.memory_space<vmem>>, vector<1x128xf32>,
    %c1_i32 = arith.constant 1 : i32
    %7 = arith.addi %0, %c1_i32 : i32
    %8 = arith.index_cast %7 : i32 to index
    %9 = memref.load %arg1[%8] : memref<16xi32, #tpu.memory_space<smem>>
    %10 = arith.index_cast %9 : i32 to index
    %c0_2 = arith.constant 0 : index
    %11 = vector.load %arg2[%10, %c0_2] : memref<1024x128xf32, #tpu.memory_space<vmem>>, vector<1x128xf32>
    %c1 = arith.constant 1 : index
    %c0_3 = arith.constant 0 : index
    %12 = vector.load %arg3[%c1, %c0_3] : memref<16x128xf32, #tpu.memory_space<vmem>>, vector<1x128xf32>
    tpu.vector_store %arg3[%c1, %c0_3], %11 {strides = array<i32>} : memref<16x128xf32, #tpu.memory_space<vmem>>, vector<1x128xf32>,
    %c2_i32 = arith.constant 2 : i32
    %13 = arith.addi %0, %c2_i32 : i32
    %14 = arith.index_cast %13 : i32 to index
    %15 = memref.load %arg1[%14] : memref<16xi32, #tpu.memory_space<smem>>
    %16 = arith.index_cast %15 : i32 to index
    %c0_4 = arith.constant 0 : index
    %17 = vector.load %arg2[%16, %c0_4] : memref<1024x128xf32, #tpu.memory_space<vmem>>, vector<1x128xf32>
    %c2 = arith.constant 2 : index
    %c0_5 = arith.constant 0 : index
    %18 = vector.load %arg3[%c2, %c0_5] : memref<16x128xf32, #tpu.memory_space<vmem>>, vector<1x128xf32>
    tpu.vector_store %arg3[%c2, %c0_5], %17 {strides = array<i32>} : memref<16x128xf32, #tpu.memory_space<vmem>>, vector<1x128xf32>,
    %c3_i32 = arith.constant 3 : i32
    %19 = arith.addi %0, %c3_i32 : i32
    %20 = arith.index_cast %19 : i32 to index
    %21 = memref.load %arg1[%20] : memref<16xi32, #tpu.memory_space<smem>>
    %22 = arith.index_cast %21 : i32 to index
    %c0_6 = arith.constant 0 : index
    %23 = vector.load %arg2[%22, %c0_6] : memref<1024x128xf32, #tpu.memory_space<vmem>>, vector<1x128xf32>
    %c3 = arith.constant 3 : index
    %c0_7 = arith.constant 0 : index
    %24 = vector.load %arg3[%c3, %c0_7] : memref<16x128xf32, #tpu.memory_space<vmem>>, vector<1x128xf32>
    tpu.vector_store %arg3[%c3, %c0_7], %23 {strides = array<i32>} : memref<16x128xf32, #tpu.memory_space<vmem>>, vector<1x128xf32>,
    %c4_i32 = arith.constant 4 : i32
    %25 = arith.addi %0, %c4_i32 : i32
    %26 = arith.index_cast %25 : i32 to index
    %27 = memref.load %arg1[%26] : memref<16xi32, #tpu.memory_space<smem>>
    %28 = arith.index_cast %27 : i32 to index
    %c0_8 = arith.constant 0 : index
    %29 = vector.load %arg2[%28, %c0_8] : memref<1024x128xf32, #tpu.memory_space<vmem>>, vector<1x128xf32>
    %c4 = arith.constant 4 : index
    %c0_9 = arith.constant 0 : index
    %30 = vector.load %arg3[%c4, %c0_9] : memref<16x128xf32, #tpu.memory_space<vmem>>, vector<1x128xf32>
    tpu.vector_store %arg3[%c4, %c0_9], %29 {strides = array<i32>} : memref<16x128xf32, #tpu.memory_space<vmem>>, vector<1x128xf32>,
    %c5_i32 = arith.constant 5 : i32
    %31 = arith.addi %0, %c5_i32 : i32
    %32 = arith.index_cast %31 : i32 to index
    %33 = memref.load %arg1[%32] : memref<16xi32, #tpu.memory_space<smem>>
    %34 = arith.index_cast %33 : i32 to index
    %c0_10 = arith.constant 0 : index
    %35 = vector.load %arg2[%34, %c0_10] : memref<1024x128xf32, #tpu.memory_space<vmem>>, vector<1x128xf32>
    %c5 = arith.constant 5 : index
    %c0_11 = arith.constant 0 : index
    %36 = vector.load %arg3[%c5, %c0_11] : memref<16x128xf32, #tpu.memory_space<vmem>>, vector<1x128xf32>
    tpu.vector_store %arg3[%c5, %c0_11], %35 {strides = array<i32>} : memref<16x128xf32, #tpu.memory_space<vmem>>, vector<1x128xf32>,
    %c6_i32 = arith.constant 6 : i32
    %37 = arith.addi %0, %c6_i32 : i32
    %38 = arith.index_cast %37 : i32 to index
    %39 = memref.load %arg1[%38] : memref<16xi32, #tpu.memory_space<smem>>
    %40 = arith.index_cast %39 : i32 to index
    %c0_12 = arith.constant 0 : index
    %41 = vector.load %arg2[%40, %c0_12] : memref<1024x128xf32, #tpu.memory_space<vmem>>, vector<1x128xf32>
    %c6 = arith.constant 6 : index
    %c0_13 = arith.constant 0 : index
    %42 = vector.load %arg3[%c6, %c0_13] : memref<16x128xf32, #tpu.memory_space<vmem>>, vector<1x128xf32>
    tpu.vector_store %arg3[%c6, %c0_13], %41 {strides = array<i32>} : memref<16x128xf32, #tpu.memory_space<vmem>>, vector<1x128xf32>,
    %c7_i32 = arith.constant 7 : i32
    %43 = arith.addi %0, %c7_i32 : i32
    %44 = arith.index_cast %43 : i32 to index
    %45 = memref.load %arg1[%44] : memref<16xi32, #tpu.memory_space<smem>>
    %46 = arith.index_cast %45 : i32 to index
    %c0_14 = arith.constant 0 : index
    %47 = vector.load %arg2[%46, %c0_14] : memref<1024x128xf32, #tpu.memory_space<vmem>>, vector<1x128xf32>
    %c7 = arith.constant 7 : index
    %c0_15 = arith.constant 0 : index
    %48 = vector.load %arg3[%c7, %c0_15] : memref<16x128xf32, #tpu.memory_space<vmem>>, vector<1x128xf32>
    tpu.vector_store %arg3[%c7, %c0_15], %47 {strides = array<i32>} : memref<16x128xf32, #tpu.memory_space<vmem>>, vector<1x128xf32>,
    %c8_i32 = arith.constant 8 : i32
    %49 = arith.addi %0, %c8_i32 : i32
    %50 = arith.index_cast %49 : i32 to index
    %51 = memref.load %arg1[%50] : memref<16xi32, #tpu.memory_space<smem>>
    %52 = arith.index_cast %51 : i32 to index
    %c0_16 = arith.constant 0 : index
    %53 = vector.load %arg2[%52, %c0_16] : memref<1024x128xf32, #tpu.memory_space<vmem>>, vector<1x128xf32>
    %c8 = arith.constant 8 : index
    %c0_17 = arith.constant 0 : index
    %54 = vector.load %arg3[%c8, %c0_17] : memref<16x128xf32, #tpu.memory_space<vmem>>, vector<1x128xf32>
    tpu.vector_store %arg3[%c8, %c0_17], %53 {strides = array<i32>} : memref<16x128xf32, #tpu.memory_space<vmem>>, vector<1x128xf32>,
    %c9_i32 = arith.constant 9 : i32
    %55 = arith.addi %0, %c9_i32 : i32
    %56 = arith.index_cast %55 : i32 to index
    %57 = memref.load %arg1[%56] : memref<16xi32, #tpu.memory_space<smem>>
    %58 = arith.index_cast %57 : i32 to index
    %c0_18 = arith.constant 0 : index
    %59 = vector.load %arg2[%58, %c0_18] : memref<1024x128xf32, #tpu.memory_space<vmem>>, vector<1x128xf32>
    %c9 = arith.constant 9 : index
    %c0_19 = arith.constant 0 : index
    %60 = vector.load %arg3[%c9, %c0_19] : memref<16x128xf32, #tpu.memory_space<vmem>>, vector<1x128xf32>
    tpu.vector_store %arg3[%c9, %c0_19], %59 {strides = array<i32>} : memref<16x128xf32, #tpu.memory_space<vmem>>, vector<1x128xf32>,
    %c10_i32 = arith.constant 10 : i32
    %61 = arith.addi %0, %c10_i32 : i32
    %62 = arith.index_cast %61 : i32 to index
    %63 = memref.load %arg1[%62] : memref<16xi32, #tpu.memory_space<smem>>
    %64 = arith.index_cast %63 : i32 to index
    %c0_20 = arith.constant 0 : index
    %65 = vector.load %arg2[%64, %c0_20] : memref<1024x128xf32, #tpu.memory_space<vmem>>, vector<1x128xf32>
    %c10 = arith.constant 10 : index
    %c0_21 = arith.constant 0 : index
    %66 = vector.load %arg3[%c10, %c0_21] : memref<16x128xf32, #tpu.memory_space<vmem>>, vector<1x128xf32>
    tpu.vector_store %arg3[%c10, %c0_21], %65 {strides = array<i32>} : memref<16x128xf32, #tpu.memory_space<vmem>>, vector<1x128xf32>,
    %c11_i32 = arith.constant 11 : i32
    %67 = arith.addi %0, %c11_i32 : i32
    %68 = arith.index_cast %67 : i32 to index
    %69 = memref.load %arg1[%68] : memref<16xi32, #tpu.memory_space<smem>>
    %70 = arith.index_cast %69 : i32 to index
    %c0_22 = arith.constant 0 : index
    %71 = vector.load %arg2[%70, %c0_22] : memref<1024x128xf32, #tpu.memory_space<vmem>>, vector<1x128xf32>
    %c11 = arith.constant 11 : index
    %c0_23 = arith.constant 0 : index
    %72 = vector.load %arg3[%c11, %c0_23] : memref<16x128xf32, #tpu.memory_space<vmem>>, vector<1x128xf32>
    tpu.vector_store %arg3[%c11, %c0_23], %71 {strides = array<i32>} : memref<16x128xf32, #tpu.memory_space<vmem>>, vector<1x128xf32>,
    %c12_i32 = arith.constant 12 : i32
    %73 = arith.addi %0, %c12_i32 : i32
    %74 = arith.index_cast %73 : i32 to index
    %75 = memref.load %arg1[%74] : memref<16xi32, #tpu.memory_space<smem>>
    %76 = arith.index_cast %75 : i32 to index
    %c0_24 = arith.constant 0 : index
    %77 = vector.load %arg2[%76, %c0_24] : memref<1024x128xf32, #tpu.memory_space<vmem>>, vector<1x128xf32>
    %c12 = arith.constant 12 : index
    %c0_25 = arith.constant 0 : index
    %78 = vector.load %arg3[%c12, %c0_25] : memref<16x128xf32, #tpu.memory_space<vmem>>, vector<1x128xf32>
    tpu.vector_store %arg3[%c12, %c0_25], %77 {strides = array<i32>} : memref<16x128xf32, #tpu.memory_space<vmem>>, vector<1x128xf32>,
    %c13_i32 = arith.constant 13 : i32
    %79 = arith.addi %0, %c13_i32 : i32
    %80 = arith.index_cast %79 : i32 to index
    %81 = memref.load %arg1[%80] : memref<16xi32, #tpu.memory_space<smem>>
    %82 = arith.index_cast %81 : i32 to index
    %c0_26 = arith.constant 0 : index
    %83 = vector.load %arg2[%82, %c0_26] : memref<1024x128xf32, #tpu.memory_space<vmem>>, vector<1x128xf32>
    %c13 = arith.constant 13 : index
    %c0_27 = arith.constant 0 : index
    %84 = vector.load %arg3[%c13, %c0_27] : memref<16x128xf32, #tpu.memory_space<vmem>>, vector<1x128xf32>
    tpu.vector_store %arg3[%c13, %c0_27], %83 {strides = array<i32>} : memref<16x128xf32, #tpu.memory_space<vmem>>, vector<1x128xf32>,
    %c14_i32 = arith.constant 14 : i32
    %85 = arith.addi %0, %c14_i32 : i32
    %86 = arith.index_cast %85 : i32 to index
    %87 = memref.load %arg1[%86] : memref<16xi32, #tpu.memory_space<smem>>
    %88 = arith.index_cast %87 : i32 to index
    %c0_28 = arith.constant 0 : index
    %89 = vector.load %arg2[%88, %c0_28] : memref<1024x128xf32, #tpu.memory_space<vmem>>, vector<1x128xf32>
    %c14 = arith.constant 14 : index
    %c0_29 = arith.constant 0 : index
    %90 = vector.load %arg3[%c14, %c0_29] : memref<16x128xf32, #tpu.memory_space<vmem>>, vector<1x128xf32>
    tpu.vector_store %arg3[%c14, %c0_29], %89 {strides = array<i32>} : memref<16x128xf32, #tpu.memory_space<vmem>>, vector<1x128xf32>,
    %c15_i32 = arith.constant 15 : i32
    %91 = arith.addi %0, %c15_i32 : i32
    %92 = arith.index_cast %91 : i32 to index
    %93 = memref.load %arg1[%92] : memref<16xi32, #tpu.memory_space<smem>>
    %94 = arith.index_cast %93 : i32 to index
    %c0_30 = arith.constant 0 : index
    %95 = vector.load %arg2[%94, %c0_30] : memref<1024x128xf32, #tpu.memory_space<vmem>>, vector<1x128xf32>
    %c15 = arith.constant 15 : index
    %c0_31 = arith.constant 0 : index
    %96 = vector.load %arg3[%c15, %c0_31] : memref<16x128xf32, #tpu.memory_space<vmem>>, vector<1x128xf32>
    tpu.vector_store %arg3[%c15, %c0_31], %95 {strides = array<i32>} : memref<16x128xf32, #tpu.memory_space<vmem>>, vector<1x128xf32>,
    return
  }
  func.func @transform_0(%arg0: i32, %arg1: memref<16xi32, #tpu.memory_space<smem>>) -> (i32, i32) {
    %c0_i32 = arith.constant 0 : i32
    %c0_i32_0 = arith.constant 0 : i32
    %c0_i32_1 = arith.constant 0 : i32
    return %c0_i32, %c0_i32_0 : i32, i32
  }
  func.func @transform_1(%arg0: i32, %arg1: memref<16xi32, #tpu.memory_space<smem>>) -> (i32, i32) {
    %c0_i32 = arith.constant 0 : i32
    %c0_i32_0 = arith.constant 0 : i32
    return %arg0, %c0_i32 : i32, i32
  }
}

</mosaic_0001>

<bundles_post_ra>
// kernel: keys_forward.1
= control target key start
LH: loop header
LB: loop body
LE: loop exit
PB: predicated region body
PF: predicated region fallthrough
CT: control target
= control target key end

     0   :  { %s290_s0 = inlined_call_operand.vmem [shape: s32[16], index: 0, kind: input, shape index: {}]   ;;  %s291_s1 = inlined_call_operand.hbm [shape: f32[1024,128], index: 1, kind: input, shape index: {}]   ;;  %s292_s2 = inlined_call_operand.hbm [shape: f32[16,128], index: 2, kind: output, shape index: {}]  }
   0x1   :  { %s7_s11 = sshll.u32 %s290_s0, 4  ;;  %s8_s11 = int_to_ptr.vmem [resolvable:$true] %s7_s11 }
   0x2   :  { %s163_s12 = scalar_lea.vmem %s8_s11, 16  ;;  %p168_p1 = scmp.lt.s32.totalorder %s8_s11, %s8_s11 }
   0x3   :  { %p164_p0 = scmp.ne.s32.totalorder %s8_s11, %s163_s12  ;;  %p169_p2 = scmp.lt.s32.totalorder %s163_s12, %s163_s12 }
   0x5   :  { %p170_p3 = por %p169_p2, %p168_p1 }
   0x7   :  { %p171_p4 = pnand %p170_p3, %p164_p0 }
   0x9   :  { %174 = shalt.err (!%p171_p4)  }
   0xa   :  { %s225_s13 = smov [#allocation3]  }
   0xb   :  { %10 = dma.vmem_to_smem %s8_s11, 16, %s225_s13, [#allocation2] }
   0xc   :  { %219 = dma.done.wait [#allocation2], 16 }
   0xd   :  { %220 = vsyncadd [#allocation2], 4294967280 }
   0xe   :  { %12 = sfence }
   0xf   :  { %13 = vsyncpa [#allocation5], 0 }
  0x10   :  { %14 = vsyncpa [#allocation6], 0  ;;  %s226_s14 = smov [#allocation4]   ;;  %s175_s17 = scalar_lea.hbm %s291_s1, 16384 }
  0x11   :  { %s20_s15 = sshll.u32 %s226_s14, 4  ;;  %p176_p5 = scmp.ne.s32.totalorder %s291_s1, %s175_s17  ;;  %s21_s15 = int_to_ptr.vmem [resolvable:$true] %s20_s15 }
  0x12   :  { %p179_p6 = scmp.lt.u32.totalorder %s175_s17, %s291_s1 }
  0x14   :  { %p181_p7 = pnand %p179_p6, %p176_p5 }
  0x16   :  { %184 = shalt.err (!%p181_p7)
}
  0x17   :  { %s185_s22 = scalar_lea.vmem %s21_s15, 16384  ;;  %p190_p9 = scmp.lt.s32.totalorder %s21_s15, %s21_s15 }
  0x18   :  { %p186_p8 = scmp.ne.s32.totalorder %s21_s15, %s185_s22  ;;  %p191_p10 = scmp.lt.s32.totalorder %s185_s22, %s185_s22 }
  0x1a   :  { %p192_p11 = por %p191_p10, %p190_p9 }
  0x1c   :  { %p193_p12 = pnand %p192_p11, %p186_p8 }
  0x1e   :  { %196 = shalt.err (!%p193_p12)
}
  0x1f   :  { %s227_s23 = smov 128   ;;  %s228_s24 = smov 8  }
  0x20   :  { %26 = dma.hbm_to_vmem [thread:$0]  %s291_s1, 16384, %s21_s15, [#allocation5], %s227_s23, %s227_s23, %s228_s24  }
  0x21   :  { %221 = dma.done.wait [#allocation5], 16384  }
  0x22   :  { %222 = vsyncadd [#allocation5], 4294950912  ;;  %s31_s27 = sld [smem:[#allocation3]]  ;;  %s143_s28 = sld [smem:[#allocation3 + $0x1]] }
  0x23   :  { %s144_s29 = sld [smem:[#allocation3 + $0x2]]  ;;  %s145_s30 = sld [smem:[#allocation3 + $0x3]] }
  0x24   :  { %s146_s3 = sld [smem:[#allocation3 + $0x4]]  ;;  %s147_s4 = sld [smem:[#allocation3 + $0x5]] }
  0x25   :  { %s148_s5 = sld [smem:[#allocation3 + $0x6]]  ;;  %s149_s6 = sld [smem:[#allocation3 + $0x7]] }
  0x26   :  { %s263_s7 = sld [smem:[#allocation3 + $0x8]]  ;;  %s265_s8 = sld [smem:[#allocation3 + $0x9]] }
  0x27   :  { %s267_s9 = sld [smem:[#allocation3 + $0xa]]  ;;  %s269_s10 = sld [smem:[#allocation3 + $0xb]] }
  0x28   :  { %s32_s11 = scalar_lea.vmem [#allocation4], %s31_s27  ;;  %s37_s1 = scalar_lea.vmem [#allocation4], %s143_s28 }
  0x29   :  { %v33_v0 = vld [vmem:[%s32_s11] sm:$0x1]  ;;  %s42_s12 = scalar_lea.vmem [#allocation4], %s144_s29  ;;  %s47_s13 = scalar_lea.vmem [#allocation4], %s145_s30 }
  0x2a   :  { %v38_v1 = vld [vmem:[%s37_s1] sm:$0x1]  ;;  %34 = vst [vmem:[#allocation7] sm:$0x1] %v33_v0  ;;  %s52_s14 = scalar_lea.vmem [#allocation4], %s146_s3  ;;  %s57_s15 = scalar_lea.vmem [#allocation4], %s147_s4 }
  0x2b   :  { %39 = vst [vmem:[#allocation7 + $0x1] sm:$0x1] %v38_v1  ;;  %v43_v2 = vld [vmem:[%s42_s12] sm:$0x1]  ;;  %s62_s16 = scalar_lea.vmem [#allocation4], %s148_s5  ;;  %s67_s0 = scalar_lea.vmem [#allocation4], %s149_s6 }
  0x2c   :  { %v48_v3 = vld [vmem:[%s47_s13] sm:$0x1]  ;;  %44 = vst [vmem:[#allocation7 + $0x2] sm:$0x1] %v43_v2  ;;  %s72_s17 = scalar_lea.vmem [#allocation4], %s263_s7  ;;  %s77_s18 = scalar_lea.vmem [#allocation4], %s265_s8 }
  0x2d   :  { %49 = vst [vmem:[#allocation7 + $0x3] sm:$0x1] %v48_v3  ;;  %v53_v4 = vld [vmem:[%s52_s14] sm:$0x1]  ;;  %s82_s19 = scalar_lea.vmem [#allocation4], %s267_s9  ;;  %s87_s20 = scalar_lea.vmem [#allocation4], %s269_s10 }
  0x2e   :  { %v58_v5 = vld [vmem:[%s57_s15] sm:$0x1]  ;;  %54 = vst [vmem:[#allocation7 + $0x4] sm:$0x1] %v53_v4  ;;  %s154_s21 = sld [smem:[#allocation3 + $0xc]]  ;;  %s155_s22 = sld [smem:[#allocation3 + $0xd]] }
  0x2f   :  { %59 = vst [vmem:[#allocation7 + $0x5] sm:$0x1] %v58_v5  ;;  %v63_v6 = vld [vmem:[%s62_s16] sm:$0x1]  ;;  %s156_s25 = sld [smem:[#allocation3 + $0xe]]  ;;  %s157_s26 = sld [smem:[#allocation3 + $0xf]] }
  0x30   :  { %v68_v7 = vld [vmem:[%s67_s0] sm:$0x1]  ;;  %64 = vst [vmem:[#allocation7 + $0x6] sm:$0x1] %v63_v6  ;;  %s229_s27 = smov [#allocation7]  }
  0x31   :  { %69 = vst [vmem:[#allocation7 + $0x7] sm:$0x1] %v68_v7  ;;  %v73_v8 = vld [vmem:[%s72_s17] sm:$0x1]  ;;  %s115_s28 = sshll.u32 %s229_s27, 4  ;;  %s116_s28 = int_to_ptr.vmem [resolvable:$true] %s115_s28 }
  0x32   :  { %v78_v9 = vld [vmem:[%s77_s18] sm:$0x1]  ;;  %74 = vst [vmem:[#allocation7 + $0x8] sm:$0x1] %v73_v8  ;;  %s197_s5 = scalar_lea.vmem %s116_s28, 256  ;;  %p202_p0 = scmp.lt.s32.totalorder %s116_s28, %s116_s28 }
  0x33   :  { %79 = vst [vmem:[#allocation7 + $0x9] sm:$0x1] %v78_v9  ;;  %v83_v10 = vld [vmem:[%s82_s19] sm:$0x1]  ;;  %p198_p13 = scmp.ne.s32.totalorder %s116_s28, %s197_s5  ;;  %p203_p1 = scmp.lt.s32.totalorder %s197_s5, %s197_s5 }
  0x34   :  { %v88_v11 = vld [vmem:[%s87_s20] sm:$0x1]  ;;  %84 = vst [vmem:[#allocation7 + $0xa] sm:$0x1] %v83_v10  ;;  %s92_s29 = scalar_lea.vmem [#allocation4], %s154_s21  ;;  %s97_s30 = scalar_lea.vmem [#allocation4], %s155_s22 }
  0x35   :  { %89 = vst [vmem:[#allocation7 + $0xb] sm:$0x1] %v88_v11  ;;  %v93_v12 = vld [vmem:[%s92_s29] sm:$0x1]  ;;  %s102_s3 = scalar_lea.vmem [#allocation4], %s156_s25  ;;  %s107_s4 = scalar_lea.vmem [#allocation4], %s157_s26 }
  0x36   :  { %94 = vst [vmem:[#allocation7 + $0xc] sm:$0x1] %v93_v12  ;;  %v98_v13 = vld [vmem:[%s97_s30] sm:$0x1]  ;;  %p204_p2 = por %p203_p1, %p202_p0 }
  0x37   :  { %v103_v14 = vld [vmem:[%s102_s3] sm:$0x1]  ;;  %99 = vst [vmem:[#allocation7 + $0xd] sm:$0x1] %v98_v13 }
  0x38   :  { %104 = vst [vmem:[#allocation7 + $0xe] sm:$0x1] %v103_v14  ;;  %v108_v15 = vld [vmem:[%s107_s4] sm:$0x1]  ;;  %p205_p3 = pnand %p204_p2, %p198_p13 }
  0x39   :  { %109 = vst [vmem:[#allocation7 + $0xf] sm:$0x1] %v108_v15 }
  0x3a   :  { %208 = shalt.err (!%p205_p3)
}
  0x3b   :  { %s209_s8 = scalar_lea.hbm %s292_s2, 256 }
  0x3c   :  { %p210_p4 = scmp.ne.s32.totalorder %s292_s2, %s209_s8  ;;  %p213_p5 = scmp.lt.u32.totalorder %s209_s8, %s292_s2 }
  0x3e   :  { %p215_p6 = pnand %p213_p5, %p210_p4 }
  0x40   :  { %218 = shalt.err (!%p215_p6)
}
  0x41   :  { %121 = dma.vmem_to_hbm [thread:$0]  %s116_s28, 256, %s292_s2, [#allocation6], %s227_s23, %s227_s23, %s228_s24  }
  0x42   :  { %223 = dma.done.wait [#allocation6], 256  }
  0x43   :  { %224 = vsyncadd [#allocation6], 4294967040 }
  0x44   :  { %125 = vsyncpa [#allocation5], 1 }
  0x45   :  { %126 = vsyncpa [#allocation6], 1 }

</bundles_post_ra>
